<compile_context>
chip_gen: v5e
topology: v5e:2x2
jax: 0.10.0
libtpu: 0.0.40
codegen_flags: <defaults>
</compile_context>

<pallas_src>
import functools

import jax
import jax.numpy as jnp
from jax import lax
from jax.experimental import pallas as pl
from jax.experimental.pallas import tpu as pltpu


# ----------------------------------------------------------------------------
# helpers
# ----------------------------------------------------------------------------
def _round_up(x: int, m: int) -> int:
    return (x + m - 1) // m * m


def _cdiv(a: int, b: int) -> int:
    return -(-a // b)


def _vmem_capacity_bytes() -> int:
    """Physical VMEM of the current generation; conservative fallback."""
    try:
        info = pltpu.get_tpu_info()
        cap = getattr(info, "vmem_capacity_bytes", None)
        if cap:
            return int(cap)
    except Exception:
        pass
    return 64 << 20  # v7x-sized conservative default


def _resident_spec_factory():
    """Constant-index (weight/bias) BlockSpec maker; single-buffer if possible."""
    if hasattr(pl, "Buffered"):
        try:
            # Probe: identical construction to the real specs below.
            pl.BlockSpec((1, 128), lambda c: (0, 0), pipeline_mode=pl.Buffered(1))

            def make(shape):
                return pl.BlockSpec(
                    shape, lambda c: (0,) * len(shape),
                    pipeline_mode=pl.Buffered(1))

            return make, True
        except Exception:
            pass

    def make(shape):
        return pl.BlockSpec(shape, lambda c: (0,) * len(shape))

    return make, False


# ----------------------------------------------------------------------------
# Pallas kernel
# ----------------------------------------------------------------------------
def _make_rnn_kernel(num_layers: int, Tt: int, B_p: int, T_valid: int,
                     needs_mask: bool, unroll: int, n_seq: int):
    """One time chunk of the multi-layer tanh RNN.

    Ref order:
      inputs : emb chunk (Tt*B_p, E_p) bf16,
               then per layer: w_ih (in_p, H_p) bf16, w_hh (H_p, H_p) bf16,
                               b (1, H_p) f32
      output : h_last (B_p, H_p) f32 -- top-layer hidden (resident block)
      scratch: h_state (num_layers, B_p, H_p) f32  carried across chunks
               seq_0 [, seq_1] (Tt*B_p, H_p) bf16  ping-pong per-layer sequence
    """

    def kernel(*refs):
        emb_ref = refs[0]
        idx = 1
        layer_refs = []
        for _ in range(num_layers):
            layer_refs.append((refs[idx], refs[idx + 1], refs[idx + 2]))
            idx += 3
        out_ref = refs[idx]
        h_state_ref = refs[idx + 1]
        seq_refs = [refs[idx + 2 + i] for i in range(n_seq)]

        chunk = pl.program_id(0)

        # init_hidden == None -> zeros (zero the carry at the first chunk).
        @pl.when(chunk == 0)
        def _():
            h_state_ref[...] = jnp.zeros_like(h_state_ref)

        chunk_base = chunk * Tt

        read_ref = emb_ref
        for l in range(num_layers):
            w_ih_ref, w_hh_ref, b_ref = layer_refs[l]
            write_ref = seq_refs[l % n_seq]

            # (1) Hoisted input projection: one well-shaped bf16 MXU GEMM for
            #     the whole chunk, f32 accumulation, bias folded in here.
            #     Ping-pong buffers -> no full-block in-place read/overwrite.
            x2d = read_ref[...]
            pre = jnp.dot(x2d, w_ih_ref[...],
                          preferred_element_type=jnp.float32) + b_ref[...]
            write_ref[...] = pre.astype(jnp.bfloat16)

            # (2) Serial recurrence: only (B_p, H_p) x (H_p, H_p) + tanh/step.
            w_hh = w_hh_ref[...]                 # hoist weight load (bf16)
            write_back = l != num_layers - 1     # top layer's sequence unused

            def body(t, h, _w=w_hh, _wb=write_back, _seq=write_ref):
                row = pl.multiple_of(t * B_p, B_p)
                pre_t = _seq[pl.ds(row, B_p), :].astype(jnp.float32)
                hw = jnp.dot(h.astype(jnp.bfloat16), _w,
                             preferred_element_type=jnp.float32)
                h_new = jnp.tanh(pre_t + hw)
                if needs_mask:
                    # Padded timesteps (T padded up to a chunk multiple) must
                    # not advance the hidden state.
                    h_new = jnp.where(chunk_base + t < T_valid, h_new, h)
                if _wb:
                    # read-before-write on the same rows within a step: safe.
                    _seq[pl.ds(row, B_p), :] = h_new.astype(jnp.bfloat16)
                return h_new

            h_final = lax.fori_loop(0, Tt, body, h_state_ref[l], unroll=unroll)
            h_state_ref[l] = h_final
            read_ref = write_ref

        # Output block index is constant across the grid; only the last chunk
        # needs to populate it.
        @pl.when(chunk == pl.num_programs(0) - 1)
        def _():
            out_ref[...] = h_state_ref[num_layers - 1]

    return kernel


# ----------------------------------------------------------------------------
# Wrapper (embedding gather, padding, and final FC are plain-XLA glue)
# ----------------------------------------------------------------------------
@functools.partial(jax.jit, static_argnames=("num_layers", "time_chunk"))
def multilayer_rnn_forward(x, params, *, num_layers, time_chunk=None):
    """x: (B, T) int32 token ids. Returns logits (B, V) float32."""
    emb_table = params["embedding"]      # (V, E), row 0 zero (padding_idx=0)
    fc_w = params["fc_w"]                # (H, V)  pre-transposed
    fc_b = params["fc_b"]                # (1, V)

    B, T = x.shape
    V, E = emb_table.shape
    H = fc_w.shape[0]

    # Hardware tile padding: batch -> bf16 sublane multiple (16), features ->
    # lane multiples (128). Zero padding keeps the math exact (padded hidden
    # lanes stay exactly 0 through the recurrence).
    B_p = _round_up(B, 16)
    E_p = _round_up(E, 128)
    H_p = _round_up(H, 128)

    vmem_cap = _vmem_capacity_bytes()

    # Per-generation time-chunk target: v5e/v6e (128 MiB VMEM) take bigger
    # chunks; v7x (64 MiB) stays at 64. T is padded up to a chunk multiple and
    # padded steps are masked inside the kernel (no divisibility cliff).
    if time_chunk is not None:
        target = int(time_chunk)
    else:
        target = 128 if vmem_cap >= (96 << 20) else 64
    target = max(1, min(target, T))
    num_chunks = _cdiv(T, target)
    Tt = _cdiv(T, num_chunks)
    T_pad = Tt * num_chunks
    needs_mask = T_pad != T

    unroll = 1
    for u in range(min(Tt, 16), 0, -1):
        if Tt % u == 0:
            unroll = u
            break

    # Embedding lookup (gather) stays in XLA glue; tokens -> time-major bf16
    # rows (T_pad*B_p, E_p).
    embedded = jnp.take(emb_table, x, axis=0).astype(jnp.bfloat16)   # (B,T,E)
    emb_tm = jnp.transpose(embedded, (1, 0, 2))                      # (T,B,E)
    emb_tm = jnp.pad(emb_tm, ((0, T_pad - T), (0, B_p - B), (0, E_p - E)))
    emb_2d = emb_tm.reshape(T_pad * B_p, E_p)

    make_resident, single_buffer_weights = _resident_spec_factory()

    kernel_inputs = [emb_2d]
    in_specs = [pl.BlockSpec((Tt * B_p, E_p), lambda c: (c, 0))]
    w_bytes = 0
    for l in range(num_layers):
        in_dim = E if l == 0 else H
        in_p = E_p if l == 0 else H_p
        w_ih = jnp.pad(params[f"w_ih_{l}"],
                       ((0, in_p - in_dim), (0, H_p - H))).astype(jnp.bfloat16)
        w_hh = jnp.pad(params[f"w_hh_{l}"],
                       ((0, H_p - H), (0, H_p - H))).astype(jnp.bfloat16)
        b = jnp.pad(params[f"b_{l}"], ((0, 0), (0, H_p - H)))  # f32
        kernel_inputs += [w_ih, w_hh, b]
        in_specs += [
            make_resident((in_p, H_p)),
            make_resident((H_p, H_p)),
            make_resident((1, H_p)),
        ]
        w_bytes += in_p * H_p * 2 + H_p * H_p * 2 + H_p * 4

    n_seq = 2 if num_layers > 1 else 1

    # VMEM budget; honest per-device cap (<= physical capacity - 8 MiB).
    est_bytes = (
        2 * Tt * B_p * E_p * 2                                # emb chunk, 2-buf
        + (1 if single_buffer_weights else 2) * w_bytes       # weights + biases
        + 2 * B_p * H_p * 4                                   # output block
        + n_seq * Tt * B_p * H_p * 2                          # seq ping-pong
        + num_layers * B_p * H_p * 4                          # hidden carry
    )
    vmem_limit = int(min(max(est_bytes + (8 << 20), 32 << 20),
                         vmem_cap - (8 << 20)))

    kernel = _make_rnn_kernel(num_layers, Tt, B_p, T, needs_mask, unroll, n_seq)

    scratch_shapes = [pltpu.VMEM((num_layers, B_p, H_p), jnp.float32)]
    scratch_shapes += [pltpu.VMEM((Tt * B_p, H_p), jnp.bfloat16)
                       for _ in range(n_seq)]

    h_last_p = pl.pallas_call(
        kernel,
        out_shape=jax.ShapeDtypeStruct((B_p, H_p), jnp.float32),
        grid=(num_chunks,),
        in_specs=in_specs,
        out_specs=pl.BlockSpec((B_p, H_p), lambda c: (0, 0)),
        scratch_shapes=scratch_shapes,
        compiler_params=pltpu.CompilerParams(
            dimension_semantics=("arbitrary",),
            vmem_limit_bytes=vmem_limit,
        ),
    )(*kernel_inputs)

    # FC on the last timestep's top-layer hidden, in f32 XLA so the (H, V)
    # vocab-sized weight never has to be VMEM resident.
    h_last = h_last_p[:B, :H]
    return h_last @ fc_w + fc_b


# ----------------------------------------------------------------------------
# Deterministic parameter init (mirrors nn.Embedding / nn.RNN / nn.Linear)
# ----------------------------------------------------------------------------
def init_params(key, vocab_size, embedding_dim, hidden_dim, num_layers):
    keys = jax.random.split(key, 4 + 4 * num_layers)
    k_emb, k_fcw, k_fcb = keys[0], keys[1], keys[2]

    emb = jax.random.normal(k_emb, (vocab_size, embedding_dim), jnp.float32)
    emb = emb.at[0].set(0.0)  # padding_idx=0 -> zero row

    params = {"embedding": emb}

    bound_rnn = 1.0 / jnp.sqrt(jnp.float32(hidden_dim))
    for l in range(num_layers):
        in_dim = embedding_dim if l == 0 else hidden_dim
        kw_ih, kw_hh, kb_ih, kb_hh = keys[3 + 4 * l: 3 + 4 * l + 4]
        # PyTorch stores weight_ih as (H, in); pre-transpose to (in, H).
        w_ih = jax.random.uniform(
            kw_ih, (hidden_dim, in_dim), jnp.float32, -bound_rnn, bound_rnn).T
        w_hh = jax.random.uniform(
            kw_hh, (hidden_dim, hidden_dim), jnp.float32, -bound_rnn, bound_rnn).T
        b_ih = jax.random.uniform(
            kb_ih, (hidden_dim,), jnp.float32, -bound_rnn, bound_rnn)
        b_hh = jax.random.uniform(
            kb_hh, (hidden_dim,), jnp.float32, -bound_rnn, bound_rnn)
        params[f"w_ih_{l}"] = w_ih
        params[f"w_hh_{l}"] = w_hh
        params[f"b_{l}"] = (b_ih + b_hh).reshape(1, hidden_dim)

    bound_fc = 1.0 / jnp.sqrt(jnp.float32(hidden_dim))
    fc_w = jax.random.uniform(
        k_fcw, (vocab_size, hidden_dim), jnp.float32, -bound_fc, bound_fc).T
    fc_b = jax.random.uniform(
        k_fcb, (vocab_size,), jnp.float32, -bound_fc, bound_fc
    ).reshape(1, vocab_size)
    params["fc_w"] = fc_w
    params["fc_b"] = fc_b
    return params


# ----------------------------------------------------------------------------
# Pure-JAX f32 reference for the correctness check
# ----------------------------------------------------------------------------
def reference_forward(x, params, num_layers):
    emb = jnp.take(params["embedding"], x, axis=0)  # (B, T, E)
    B, T, _ = emb.shape
    H = params["fc_w"].shape[0]
    seq = emb
    for l in range(num_layers):
        w_ih, w_hh, b = params[f"w_ih_{l}"], params[f"w_hh_{l}"], params[f"b_{l}"]
        h = jnp.zeros((B, H), jnp.float32)
        outs = []
        for t in range(T):
            h = jnp.tanh(seq[:, t, :] @ w_ih + h @ w_hh + b)
            outs.append(h)
        seq = jnp.stack(outs, axis=1)
    last_hidden = seq[:, -1, :]
    return last_hidden @ params["fc_w"] + params["fc_b"]


if __name__ == "__main__":
    vocab_size, embedding_dim, hidden_dim, num_layers = 64, 32, 32, 2
    batch, seq_len = 2, 8

    key = jax.random.PRNGKey(0)
    k_params, k_x = jax.random.split(key)
    params = init_params(k_params, vocab_size, embedding_dim, hidden_dim, num_layers)
    x = jax.random.randint(k_x, (batch, seq_len), 0, vocab_size, dtype=jnp.int32)

    ref = reference_forward(x, params, num_layers)

    # bf16 MXU operands -> slightly looser tolerance than a pure-f32 check.
    tol = dict(rtol=5e-2, atol=5e-2)

    # (a) multi-chunk carry: time_chunk=4 -> 2 chunks over T=8.
    out_a = jax.block_until_ready(
        multilayer_rnn_forward(x, params, num_layers=num_layers, time_chunk=4))
    assert out_a.shape == (batch, vocab_size)
    assert jnp.allclose(out_a, ref, **tol), "mismatch (multi-chunk) vs reference"

    # (b) non-divisible path: time_chunk=3 -> T padded to 9, masked last step.
    out_b = jax.block_until_ready(
        multilayer_rnn_forward(x, params, num_layers=num_layers, time_chunk=3))
    assert jnp.allclose(out_b, ref, **tol), "mismatch (masked tail) vs reference"

    # (c) default device-sized chunking (single chunk at this tiny T).
    out_c = jax.block_until_ready(
        multilayer_rnn_forward(x, params, num_layers=num_layers))
    assert jnp.allclose(out_c, ref, **tol), "mismatch (default chunk) vs reference"

    print("KERNEL_OK")
</pallas_src>

<mosaic_0001>
module attributes {stable_mosaic.version = 11 : i64} {
  func.func @kernel(%arg0: i32, %arg1: memref<64x128xbf16, #tpu.memory_space<vmem>>, %arg2: memref<128x128xbf16, #tpu.memory_space<vmem>>, %arg3: memref<128x128xbf16, #tpu.memory_space<vmem>>, %arg4: memref<1x128xf32, #tpu.memory_space<vmem>>, %arg5: memref<128x128xbf16, #tpu.memory_space<vmem>>, %arg6: memref<128x128xbf16, #tpu.memory_space<vmem>>, %arg7: memref<1x128xf32, #tpu.memory_space<vmem>>, %arg8: memref<16x128xf32, #tpu.memory_space<vmem>>, %arg9: memref<2x16x128xf32, #tpu.memory_space<vmem>>, %arg10: memref<64x128xbf16, #tpu.memory_space<vmem>>, %arg11: memref<64x128xbf16, #tpu.memory_space<vmem>>) attributes {dimension_semantics = [#tpu.dimension_semantics<arbitrary>], iteration_bounds = array<i64: 2>, scalar_prefetch = 0 : i64, scratch_operands = 3 : i64, tpu.core_type = #tpu.core_type<tc>, window_params = [{transform_indices = @transform_0, window_bounds = array<i64: 64, 128>}, {pipeline_mode = #tpu.pipeline_mode<synchronous>, transform_indices = @transform_1, window_bounds = array<i64: 128, 128>}, {pipeline_mode = #tpu.pipeline_mode<synchronous>, transform_indices = @transform_2, window_bounds = array<i64: 128, 128>}, {pipeline_mode = #tpu.pipeline_mode<synchronous>, transform_indices = @transform_3, window_bounds = array<i64: 1, 128>}, {pipeline_mode = #tpu.pipeline_mode<synchronous>, transform_indices = @transform_4, window_bounds = array<i64: 128, 128>}, {pipeline_mode = #tpu.pipeline_mode<synchronous>, transform_indices = @transform_5, window_bounds = array<i64: 128, 128>}, {pipeline_mode = #tpu.pipeline_mode<synchronous>, transform_indices = @transform_6, window_bounds = array<i64: 1, 128>}, {pipeline_mode = #tpu.pipeline_mode<synchronous>, transform_indices = @transform_7, window_bounds = array<i64: 16, 128>}]} {
    %c0_i32 = arith.constant 0 : i32
    %0 = arith.cmpi eq, %arg0, %c0_i32 : i32
    %1 = arith.extui %0 : i1 to i32
    %c0_i32_0 = arith.constant 0 : i32
    %2 = arith.cmpi ne, %1, %c0_i32_0 : i32
    scf.if %2 {
      %cst_67 = arith.constant 0.000000e+00 : f32
      %118 = vector.broadcast %cst_67 : f32 to vector<2x16x128xf32>
      %c0_68 = arith.constant 0 : index
      %c0_69 = arith.constant 0 : index
      %c0_70 = arith.constant 0 : index
      %119 = vector.load %arg9[%c0_68, %c0_69, %c0_70] : memref<2x16x128xf32, #tpu.memory_space<vmem>>, vector<2x16x128xf32>
      tpu.vector_store %arg9[%c0_68, %c0_69, %c0_70], %118 {strides = array<i32>} : memref<2x16x128xf32, #tpu.memory_space<vmem>>, vector<2x16x128xf32>,
    } else {
    }
    %c0 = arith.constant 0 : index
    %c0_1 = arith.constant 0 : index
    %3 = vector.load %arg1[%c0, %c0_1] : memref<64x128xbf16, #tpu.memory_space<vmem>>, vector<64x128xbf16>
    %c0_2 = arith.constant 0 : index
    %c0_3 = arith.constant 0 : index
    %4 = vector.load %arg2[%c0_2, %c0_3] : memref<128x128xbf16, #tpu.memory_space<vmem>>, vector<128x128xbf16>
    %cst = arith.constant dense<0.000000e+00> : vector<64x128xf32>
    %5 = tpu.matmul %3, %4, %cst {dimension_numbers = #tpu.dot_dimension_numbers<[1], [0], [0], [1], [0, 0, 1, 1], [], []>} : vector<64x128xbf16>, vector<128x128xbf16>, vector<64x128xf32> -> vector<64x128xf32>
    %c0_4 = arith.constant 0 : index
    %c0_5 = arith.constant 0 : index
    %6 = vector.load %arg4[%c0_4, %c0_5] : memref<1x128xf32, #tpu.memory_space<vmem>>, vector<1x128xf32>
    %7 = vector.broadcast %6 : vector<1x128xf32> to vector<64x128xf32>
    %8 = arith.addf %5, %7 : vector<64x128xf32>
    %9 = arith.truncf %8 : vector<64x128xf32> to vector<64x128xbf16>
    %c0_6 = arith.constant 0 : index
    %c0_7 = arith.constant 0 : index
    %10 = vector.load %arg10[%c0_6, %c0_7] : memref<64x128xbf16, #tpu.memory_space<vmem>>, vector<64x128xbf16>
    tpu.vector_store %arg10[%c0_6, %c0_7], %9 {strides = array<i32>} : memref<64x128xbf16, #tpu.memory_space<vmem>>, vector<64x128xbf16>,
    %c0_8 = arith.constant 0 : index
    %c0_9 = arith.constant 0 : index
    %11 = vector.load %arg3[%c0_8, %c0_9] : memref<128x128xbf16, #tpu.memory_space<vmem>>, vector<128x128xbf16>
    %c0_10 = arith.constant 0 : index
    %c0_11 = arith.constant 0 : index
    %c0_12 = arith.constant 0 : index
    %12 = vector.load %arg9[%c0_10, %c0_11, %c0_12] : memref<2x16x128xf32, #tpu.memory_space<vmem>>, vector<1x16x128xf32>
    %13 = vector.shape_cast %12 : vector<1x16x128xf32> to vector<16x128xf32>
    %c0_i32_13 = arith.constant 0 : i32
    %c16_i32 = arith.constant 16 : i32
    %14 = arith.muli %c0_i32_13, %c16_i32 : i32
    %15 = tpu.assume_multiple %14, 16 : i32
    %16 = arith.index_cast %15 : i32 to index
    %c0_14 = arith.constant 0 : index
    %17 = vector.load %arg10[%16, %c0_14] : memref<64x128xbf16, #tpu.memory_space<vmem>>, vector<16x128xbf16>
    %18 = arith.extf %17 : vector<16x128xbf16> to vector<16x128xf32>
    %19 = arith.truncf %13 : vector<16x128xf32> to vector<16x128xbf16>
    %cst_15 = arith.constant dense<0.000000e+00> : vector<16x128xf32>
    %20 = tpu.matmul %19, %11, %cst_15 {dimension_numbers = #tpu.dot_dimension_numbers<[1], [0], [0], [1], [0, 0, 1, 1], [], []>} : vector<16x128xbf16>, vector<128x128xbf16>, vector<16x128xf32> -> vector<16x128xf32>
    %21 = arith.addf %18, %20 : vector<16x128xf32>
    %22 = math.tanh %21 : vector<16x128xf32>
    %23 = arith.truncf %22 : vector<16x128xf32> to vector<16x128xbf16>
    %24 = arith.index_cast %15 : i32 to index
    %c0_16 = arith.constant 0 : index
    %25 = vector.load %arg10[%24, %c0_16] : memref<64x128xbf16, #tpu.memory_space<vmem>>, vector<16x128xbf16>
    tpu.vector_store %arg10[%24, %c0_16], %23 {strides = array<i32>} : memref<64x128xbf16, #tpu.memory_space<vmem>>, vector<16x128xbf16>,
    %c1_i32 = arith.constant 1 : i32
    %c16_i32_17 = arith.constant 16 : i32
    %26 = arith.muli %c1_i32, %c16_i32_17 : i32
    %27 = tpu.assume_multiple %26, 16 : i32
    %28 = arith.index_cast %27 : i32 to index
    %c0_18 = arith.constant 0 : index
    %29 = vector.load %arg10[%28, %c0_18] : memref<64x128xbf16, #tpu.memory_space<vmem>>, vector<16x128xbf16>
    %30 = arith.extf %29 : vector<16x128xbf16> to vector<16x128xf32>
    %31 = arith.truncf %22 : vector<16x128xf32> to vector<16x128xbf16>
    %cst_19 = arith.constant dense<0.000000e+00> : vector<16x128xf32>
    %32 = tpu.matmul %31, %11, %cst_19 {dimension_numbers = #tpu.dot_dimension_numbers<[1], [0], [0], [1], [0, 0, 1, 1], [], []>} : vector<16x128xbf16>, vector<128x128xbf16>, vector<16x128xf32> -> vector<16x128xf32>
    %33 = arith.addf %30, %32 : vector<16x128xf32>
    %34 = math.tanh %33 : vector<16x128xf32>
    %35 = arith.truncf %34 : vector<16x128xf32> to vector<16x128xbf16>
    %36 = arith.index_cast %27 : i32 to index
    %c0_20 = arith.constant 0 : index
    %37 = vector.load %arg10[%36, %c0_20] : memref<64x128xbf16, #tpu.memory_space<vmem>>, vector<16x128xbf16>
    tpu.vector_store %arg10[%36, %c0_20], %35 {strides = array<i32>} : memref<64x128xbf16, #tpu.memory_space<vmem>>, vector<16x128xbf16>,
    %c2_i32 = arith.constant 2 : i32
    %c16_i32_21 = arith.constant 16 : i32
    %38 = arith.muli %c2_i32, %c16_i32_21 : i32
    %39 = tpu.assume_multiple %38, 16 : i32
    %40 = arith.index_cast %39 : i32 to index
    %c0_22 = arith.constant 0 : index
    %41 = vector.load %arg10[%40, %c0_22] : memref<64x128xbf16, #tpu.memory_space<vmem>>, vector<16x128xbf16>
    %42 = arith.extf %41 : vector<16x128xbf16> to vector<16x128xf32>
    %43 = arith.truncf %34 : vector<16x128xf32> to vector<16x128xbf16>
    %cst_23 = arith.constant dense<0.000000e+00> : vector<16x128xf32>
    %44 = tpu.matmul %43, %11, %cst_23 {dimension_numbers = #tpu.dot_dimension_numbers<[1], [0], [0], [1], [0, 0, 1, 1], [], []>} : vector<16x128xbf16>, vector<128x128xbf16>, vector<16x128xf32> -> vector<16x128xf32>
    %45 = arith.addf %42, %44 : vector<16x128xf32>
    %46 = math.tanh %45 : vector<16x128xf32>
    %47 = arith.truncf %46 : vector<16x128xf32> to vector<16x128xbf16>
    %48 = arith.index_cast %39 : i32 to index
    %c0_24 = arith.constant 0 : index
    %49 = vector.load %arg10[%48, %c0_24] : memref<64x128xbf16, #tpu.memory_space<vmem>>, vector<16x128xbf16>
    tpu.vector_store %arg10[%48, %c0_24], %47 {strides = array<i32>} : memref<64x128xbf16, #tpu.memory_space<vmem>>, vector<16x128xbf16>,
    %c3_i32 = arith.constant 3 : i32
    %c16_i32_25 = arith.constant 16 : i32
    %50 = arith.muli %c3_i32, %c16_i32_25 : i32
    %51 = tpu.assume_multiple %50, 16 : i32
    %52 = arith.index_cast %51 : i32 to index
    %c0_26 = arith.constant 0 : index
    %53 = vector.load %arg10[%52, %c0_26] : memref<64x128xbf16, #tpu.memory_space<vmem>>, vector<16x128xbf16>
    %54 = arith.extf %53 : vector<16x128xbf16> to vector<16x128xf32>
    %55 = arith.truncf %46 : vector<16x128xf32> to vector<16x128xbf16>
    %cst_27 = arith.constant dense<0.000000e+00> : vector<16x128xf32>
    %56 = tpu.matmul %55, %11, %cst_27 {dimension_numbers = #tpu.dot_dimension_numbers<[1], [0], [0], [1], [0, 0, 1, 1], [], []>} : vector<16x128xbf16>, vector<128x128xbf16>, vector<16x128xf32> -> vector<16x128xf32>
    %57 = arith.addf %54, %56 : vector<16x128xf32>
    %58 = math.tanh %57 : vector<16x128xf32>
    %59 = arith.truncf %58 : vector<16x128xf32> to vector<16x128xbf16>
    %60 = arith.index_cast %51 : i32 to index
    %c0_28 = arith.constant 0 : index
    %61 = vector.load %arg10[%60, %c0_28] : memref<64x128xbf16, #tpu.memory_space<vmem>>, vector<16x128xbf16>
    tpu.vector_store %arg10[%60, %c0_28], %59 {strides = array<i32>} : memref<64x128xbf16, #tpu.memory_space<vmem>>, vector<16x128xbf16>,
    %c4_i32 = arith.constant 4 : i32
    %c0_29 = arith.constant 0 : index
    %c0_30 = arith.constant 0 : index
    %c0_31 = arith.constant 0 : index
    %62 = vector.load %arg9[%c0_29, %c0_30, %c0_31] : memref<2x16x128xf32, #tpu.memory_space<vmem>>, vector<1x16x128xf32>
    %63 = vector.shape_cast %62 : vector<1x16x128xf32> to vector<16x128xf32>
    %64 = vector.shape_cast %58 : vector<16x128xf32> to vector<1x16x128xf32>
    tpu.vector_store %arg9[%c0_29, %c0_30, %c0_31], %64 {strides = array<i32>} : memref<2x16x128xf32, #tpu.memory_space<vmem>>, vector<1x16x128xf32>,
    %c0_32 = arith.constant 0 : index
    %c0_33 = arith.constant 0 : index
    %65 = vector.load %arg10[%c0_32, %c0_33] : memref<64x128xbf16, #tpu.memory_space<vmem>>, vector<64x128xbf16>
    %c0_34 = arith.constant 0 : index
    %c0_35 = arith.constant 0 : index
    %66 = vector.load %arg5[%c0_34, %c0_35] : memref<128x128xbf16, #tpu.memory_space<vmem>>, vector<128x128xbf16>
    %cst_36 = arith.constant dense<0.000000e+00> : vector<64x128xf32>
    %67 = tpu.matmul %65, %66, %cst_36 {dimension_numbers = #tpu.dot_dimension_numbers<[1], [0], [0], [1], [0, 0, 1, 1], [], []>} : vector<64x128xbf16>, vector<128x128xbf16>, vector<64x128xf32> -> vector<64x128xf32>
    %c0_37 = arith.constant 0 : index
    %c0_38 = arith.constant 0 : index
    %68 = vector.load %arg7[%c0_37, %c0_38] : memref<1x128xf32, #tpu.memory_space<vmem>>, vector<1x128xf32>
    %69 = vector.broadcast %68 : vector<1x128xf32> to vector<64x128xf32>
    %70 = arith.addf %67, %69 : vector<64x128xf32>
    %71 = arith.truncf %70 : vector<64x128xf32> to vector<64x128xbf16>
    %c0_39 = arith.constant 0 : index
    %c0_40 = arith.constant 0 : index
    %72 = vector.load %arg11[%c0_39, %c0_40] : memref<64x128xbf16, #tpu.memory_space<vmem>>, vector<64x128xbf16>
    tpu.vector_store %arg11[%c0_39, %c0_40], %71 {strides = array<i32>} : memref<64x128xbf16, #tpu.memory_space<vmem>>, vector<64x128xbf16>,
    %c0_41 = arith.constant 0 : index
    %c0_42 = arith.constant 0 : index
    %73 = vector.load %arg6[%c0_41, %c0_42] : memref<128x128xbf16, #tpu.memory_space<vmem>>, vector<128x128xbf16>
    %c1 = arith.constant 1 : index
    %c0_43 = arith.constant 0 : index
    %c0_44 = arith.constant 0 : index
    %74 = vector.load %arg9[%c1, %c0_43, %c0_44] : memref<2x16x128xf32, #tpu.memory_space<vmem>>, vector<1x16x128xf32>
    %75 = vector.shape_cast %74 : vector<1x16x128xf32> to vector<16x128xf32>
    %c0_i32_45 = arith.constant 0 : i32
    %c16_i32_46 = arith.constant 16 : i32
    %76 = arith.muli %c0_i32_45, %c16_i32_46 : i32
    %77 = tpu.assume_multiple %76, 16 : i32
    %78 = arith.index_cast %77 : i32 to index
    %c0_47 = arith.constant 0 : index
    %79 = vector.load %arg11[%78, %c0_47] : memref<64x128xbf16, #tpu.memory_space<vmem>>, vector<16x128xbf16>
    %80 = arith.extf %79 : vector<16x128xbf16> to vector<16x128xf32>
    %81 = arith.truncf %75 : vector<16x128xf32> to vector<16x128xbf16>
    %cst_48 = arith.constant dense<0.000000e+00> : vector<16x128xf32>
    %82 = tpu.matmul %81, %73, %cst_48 {dimension_numbers = #tpu.dot_dimension_numbers<[1], [0], [0], [1], [0, 0, 1, 1], [], []>} : vector<16x128xbf16>, vector<128x128xbf16>, vector<16x128xf32> -> vector<16x128xf32>
    %83 = arith.addf %80, %82 : vector<16x128xf32>
    %84 = math.tanh %83 : vector<16x128xf32>
    %c1_i32_49 = arith.constant 1 : i32
    %c16_i32_50 = arith.constant 16 : i32
    %85 = arith.muli %c1_i32_49, %c16_i32_50 : i32
    %86 = tpu.assume_multiple %85, 16 : i32
    %87 = arith.index_cast %86 : i32 to index
    %c0_51 = arith.constant 0 : index
    %88 = vector.load %arg11[%87, %c0_51] : memref<64x128xbf16, #tpu.memory_space<vmem>>, vector<16x128xbf16>
    %89 = arith.extf %88 : vector<16x128xbf16> to vector<16x128xf32>
    %90 = arith.truncf %84 : vector<16x128xf32> to vector<16x128xbf16>
    %cst_52 = arith.constant dense<0.000000e+00> : vector<16x128xf32>
    %91 = tpu.matmul %90, %73, %cst_52 {dimension_numbers = #tpu.dot_dimension_numbers<[1], [0], [0], [1], [0, 0, 1, 1], [], []>} : vector<16x128xbf16>, vector<128x128xbf16>, vector<16x128xf32> -> vector<16x128xf32>
    %92 = arith.addf %89, %91 : vector<16x128xf32>
    %93 = math.tanh %92 : vector<16x128xf32>
    %c2_i32_53 = arith.constant 2 : i32
    %c16_i32_54 = arith.constant 16 : i32
    %94 = arith.muli %c2_i32_53, %c16_i32_54 : i32
    %95 = tpu.assume_multiple %94, 16 : i32
    %96 = arith.index_cast %95 : i32 to index
    %c0_55 = arith.constant 0 : index
    %97 = vector.load %arg11[%96, %c0_55] : memref<64x128xbf16, #tpu.memory_space<vmem>>, vector<16x128xbf16>
    %98 = arith.extf %97 : vector<16x128xbf16> to vector<16x128xf32>
    %99 = arith.truncf %93 : vector<16x128xf32> to vector<16x128xbf16>
    %cst_56 = arith.constant dense<0.000000e+00> : vector<16x128xf32>
    %100 = tpu.matmul %99, %73, %cst_56 {dimension_numbers = #tpu.dot_dimension_numbers<[1], [0], [0], [1], [0, 0, 1, 1], [], []>} : vector<16x128xbf16>, vector<128x128xbf16>, vector<16x128xf32> -> vector<16x128xf32>
    %101 = arith.addf %98, %100 : vector<16x128xf32>
    %102 = math.tanh %101 : vector<16x128xf32>
    %c3_i32_57 = arith.constant 3 : i32
    %c16_i32_58 = arith.constant 16 : i32
    %103 = arith.muli %c3_i32_57, %c16_i32_58 : i32
    %104 = tpu.assume_multiple %103, 16 : i32
    %105 = arith.index_cast %104 : i32 to index
    %c0_59 = arith.constant 0 : index
    %106 = vector.load %arg11[%105, %c0_59] : memref<64x128xbf16, #tpu.memory_space<vmem>>, vector<16x128xbf16>
    %107 = arith.extf %106 : vector<16x128xbf16> to vector<16x128xf32>
    %108 = arith.truncf %102 : vector<16x128xf32> to vector<16x128xbf16>
    %cst_60 = arith.constant dense<0.000000e+00> : vector<16x128xf32>
    %109 = tpu.matmul %108, %73, %cst_60 {dimension_numbers = #tpu.dot_dimension_numbers<[1], [0], [0], [1], [0, 0, 1, 1], [], []>} : vector<16x128xbf16>, vector<128x128xbf16>, vector<16x128xf32> -> vector<16x128xf32>
    %110 = arith.addf %107, %109 : vector<16x128xf32>
    %111 = math.tanh %110 : vector<16x128xf32>
    %c4_i32_61 = arith.constant 4 : i32
    %c1_62 = arith.constant 1 : index
    %c0_63 = arith.constant 0 : index
    %c0_64 = arith.constant 0 : index
    %112 = vector.load %arg9[%c1_62, %c0_63, %c0_64] : memref<2x16x128xf32, #tpu.memory_space<vmem>>, vector<1x16x128xf32>
    %113 = vector.shape_cast %112 : vector<1x16x128xf32> to vector<16x128xf32>
    %114 = vector.shape_cast %111 : vector<16x128xf32> to vector<1x16x128xf32>
    tpu.vector_store %arg9[%c1_62, %c0_63, %c0_64], %114 {strides = array<i32>} : memref<2x16x128xf32, #tpu.memory_space<vmem>>, vector<1x16x128xf32>,
    %c1_i32_65 = arith.constant 1 : i32
    %115 = arith.cmpi eq, %arg0, %c1_i32_65 : i32
    %116 = arith.extui %115 : i1 to i32
    %c0_i32_66 = arith.constant 0 : i32
    %117 = arith.cmpi ne, %116, %c0_i32_66 : i32
    scf.if %117 {
      %c1_67 = arith.constant 1 : index
      %c0_68 = arith.constant 0 : index
      %c0_69 = arith.constant 0 : index
      %118 = vector.load %arg9[%c1_67, %c0_68, %c0_69] : memref<2x16x128xf32, #tpu.memory_space<vmem>>, vector<1x16x128xf32>
      %119 = vector.shape_cast %118 : vector<1x16x128xf32> to vector<16x128xf32>
      %c0_70 = arith.constant 0 : index
      %c0_71 = arith.constant 0 : index
      %120 = vector.load %arg8[%c0_70, %c0_71] : memref<16x128xf32, #tpu.memory_space<vmem>>, vector<16x128xf32>
      tpu.vector_store %arg8[%c0_70, %c0_71], %119 {strides = array<i32>} : memref<16x128xf32, #tpu.memory_space<vmem>>, vector<16x128xf32>,
    } else {
    }
    return
  }
  func.func @transform_0(%arg0: i32) -> (i32, i32) {
    %c0_i32 = arith.constant 0 : i32
    %c0_i32_0 = arith.constant 0 : i32
    return %arg0, %c0_i32 : i32, i32
  }
  func.func @transform_1(%arg0: i32) -> (i32, i32) {
    %c0_i32 = arith.constant 0 : i32
    %c0_i32_0 = arith.constant 0 : i32
    %c0_i32_1 = arith.constant 0 : i32
    return %c0_i32, %c0_i32_0 : i32, i32
  }
  func.func @transform_2(%arg0: i32) -> (i32, i32) {
    %c0_i32 = arith.constant 0 : i32
    %c0_i32_0 = arith.constant 0 : i32
    %c0_i32_1 = arith.constant 0 : i32
    return %c0_i32, %c0_i32_0 : i32, i32
  }
  func.func @transform_3(%arg0: i32) -> (i32, i32) {
    %c0_i32 = arith.constant 0 : i32
    %c0_i32_0 = arith.constant 0 : i32
    %c0_i32_1 = arith.constant 0 : i32
    return %c0_i32, %c0_i32_0 : i32, i32
  }
  func.func @transform_4(%arg0: i32) -> (i32, i32) {
    %c0_i32 = arith.constant 0 : i32
    %c0_i32_0 = arith.constant 0 : i32
    %c0_i32_1 = arith.constant 0 : i32
    return %c0_i32, %c0_i32_0 : i32, i32
  }
  func.func @transform_5(%arg0: i32) -> (i32, i32) {
    %c0_i32 = arith.constant 0 : i32
    %c0_i32_0 = arith.constant 0 : i32
    %c0_i32_1 = arith.constant 0 : i32
    return %c0_i32, %c0_i32_0 : i32, i32
  }
  func.func @transform_6(%arg0: i32) -> (i32, i32) {
    %c0_i32 = arith.constant 0 : i32
    %c0_i32_0 = arith.constant 0 : i32
    %c0_i32_1 = arith.constant 0 : i32
    return %c0_i32, %c0_i32_0 : i32, i32
  }
  func.func @transform_7(%arg0: i32) -> (i32, i32) {
    %c0_i32 = arith.constant 0 : i32
    %c0_i32_0 = arith.constant 0 : i32
    %c0_i32_1 = arith.constant 0 : i32
    return %c0_i32, %c0_i32_0 : i32, i32
  }
}

</mosaic_0001>

<bundles_post_ra>
// kernel: multilayer_rnn_forward.1
= control target key start
LH: loop header
LB: loop body
LE: loop exit
PB: predicated region body
PF: predicated region fallthrough
CT: control target
= control target key end

     0   :  { %s1358_s24 = smov 0   ;;  %s1511_s0 = inlined_call_operand.vmem [shape: bf16[128,128], index: 0, kind: input, shape index: {}]   ;;  %s1512_s1 = inlined_call_operand.vmem [shape: bf16[128,128], index: 1, kind: input, shape index: {}]   ;;  %s1513_s2 = inlined_call_operand.vmem [shape: bf16[128,128], index: 2, kind: input, shape index: {}]   ;;  %s1514_s3 = inlined_call_operand.vmem [shape: f32[1,128], index: 3, kind: input, shape index: {}]   ;;  %s1515_s4 = inlined_call_operand.vmem [shape: bf16[128,128], index: 4, kind: input, shape index: {}]   ;;  %s1516_s5 = inlined_call_operand.vmem [shape: bf16[128,128], index: 5, kind: input, shape index: {}]   ;;  %s1517_s6 = inlined_call_operand.vmem [shape: f32[1,128], index: 6, kind: input, shape index: {}]   ;;  %s1518_s7 = inlined_call_operand.vmem [shape: f32[16,128], index: 7, kind: output, shape index: {}]  }
   0x1 LB: > { %s1364_s25 = sadd.s32 4294967295, %s1315_s24   ;;  %p961_p0 = scmp.ge.s32.totalorder %s1315_s24, 1  ;;  %s1315_s24 = sphi %s1358_s24, %s17_s24  }
   0x2   : > { %p233_p1 = scmp.lt.s32.totalorder %s1315_s24, 3 }
   0x4   : > { %p234_p2 = pnand %p961_p0, %p233_p1 }
   0x5   : > { %s962_s26 = sshll.u32 (!%p234_p2), %s1364_s25, 3  ;;  %p964_p4 = scmp.ne.s32.totalorder (!%p234_p2), %s1364_s25, 0 }
   0x6   : > { %237 = sbr.rel (%p234_p2) target bundleno = 979 (0x3d3), region = 48  ;;  %p261_p3 = scmp.lt.s32.totalorder (!%p234_p2), %s962_s26, 15 }
   0xb   : > { %s1520_s26 = smov (!%p261_p3, %s962_s26), 15  ;;  %269 = sbr.rel (%p964_p4) target bundleno = 21 (0x15), region = 52 }
   0xc   : > { %s963_s27 = sshll.u32 %s1520_s26, 2 }
   0xd   : > { %s1372_s30 = scalar_lea.vmem %s1511_s0, %s963_s27 }
  0x10   : > { %v1317_v0 = vmov 0.0  }
  0x11   : > { %270 = vst [vmem:[#allocation2 + $0x10] sm:$0xff] %v1317_v0 }
  0x12   : > { %271 = vst [vmem:[#allocation2] sm:$0xff] %v1317_v0 }
  0x13   : > { %272 = vst [vmem:[#allocation2 + $0x18] sm:$0xff] %v1317_v0 }
  0x14   : > { %273 = vst [vmem:[#allocation2 + $0x8] sm:$0xff] %v1317_v0 }
  0x15 PF: > { %v1139_v1 = vld [vmem:[%s1512_s1 + $0x38] sm:$0xff]  ;;  %v1138_v3 = vld [vmem:[%s1512_s1 + $0x30] sm:$0xff]  ;;  %v1137_v5 = vld [vmem:[%s1512_s1 + $0x28] sm:$0xff]  ;;  %p1125_p5 = scmp.ne.s32.totalorder %s1364_s25, 1 }
  0x16   : > { %v1147_v2 = vld [vmem:[%s1513_s2 + $0x38] sm:$0xff]  ;;  %374 = vmatpush.bf16.msra.mxu0 %v1139_v1  ;;  %v1146_v4 = vld [vmem:[%s1513_s2 + $0x30] sm:$0xff]  ;;  %v1145_v6 = vld [vmem:[%s1513_s2 + $0x28] sm:$0xff] }
  0x17   : > { %490 = vmatpush.bf16.msra.mxu1 %v1147_v2  ;;  %523 = vmatpush.bf16.msra.mxu2 %v1147_v2  ;;  %v1136_v7 = vld [vmem:[%s1512_s1 + $0x20] sm:$0xff]  ;;  %v1135_v9 = vld [vmem:[%s1512_s1 + $0x18] sm:$0xff]  ;;  %v1134_v11 = vld [vmem:[%s1512_s1 + $0x10] sm:$0xff] }
  0x18   : > { %556 = vmatpush.bf16.msra.mxu3 %v1147_v2  ;;  %v1144_v8 = vld [vmem:[%s1513_s2 + $0x20] sm:$0xff]  ;;  %v1143_v10 = vld [vmem:[%s1513_s2 + $0x18] sm:$0xff]  ;;  %v1142_v12 = vld [vmem:[%s1513_s2 + $0x10] sm:$0xff] }
  0x19   : > { %v1133_v13 = vld [vmem:[%s1512_s1 + $0x8] sm:$0xff]  ;;  %v1132_v15 = vld [vmem:[%s1512_s1] sm:$0xff]  ;;  %v435_v17 = vld [vmem:[#allocation2 + $0x10] sm:$0xff] }
  0x1a   : > { %375 = vmatpush.bf16.msra.mxu0 %v1138_v3  ;;  %v1141_v14 = vld [vmem:[%s1513_s2 + $0x8] sm:$0xff]  ;;  %v1140_v16 = vld [vmem:[%s1513_s2] sm:$0xff]  ;;  %v1159_v21 = vld [vmem:[%s1515_s4 + $0x38] sm:$0xff] }
  0x1b   : > { %491 = vmatpush.bf16.msra.mxu1 %v1146_v4  ;;  %524 = vmatpush.bf16.msra.mxu2 %v1146_v4  ;;  %v436_v18 = vld [vmem:[#allocation2] sm:$0xff]  ;;  %v1158_v22 = vld [vmem:[%s1515_s4 + $0x30] sm:$0xff]  ;;  %v1129_v23 = vld [vmem:[%s1372_s30 + $0x8] sm:$0xff] }
  0x1c   : > { %557 = vmatpush.bf16.msra.mxu3 %v1146_v4  ;;  %v1128_v19 = vld [vmem:[%s1372_s30] sm:$0xff]  ;;  %v441_v20 = vpack.c.bf16 %v436_v18, %v435_v17  ;;  %v1157_v24 = vld [vmem:[%s1515_s4 + $0x28] sm:$0xff]  ;;  %v1155_v26 = vld [vmem:[%s1515_s4 + $0x18] sm:$0xff] }
  0x1d   : > { %v1156_v25 = vld [vmem:[%s1515_s4 + $0x20] sm:$0xff]  ;;  %v1154_v28 = vld [vmem:[%s1515_s4 + $0x10] sm:$0xff]  ;;  %v1153_v30 = vld [vmem:[%s1515_s4 + $0x8] sm:$0xff] }
  0x1e   : > { %376 = vmatpush.bf16.msra.mxu0 %v1137_v5  ;;  %v1449_v31 = vld [vmem:[%s1514_s3] ss:$0 sm:$0xff]  ;;  %v1130_v51 = vld [vmem:[%s1372_s30 + $0x10] sm:$0xff]  ;;  %v1167_v52 = vld [vmem:[%s1516_s5 + $0x38] sm:$0xff] }
  0x1f   : > { %492 = vmatpush.bf16.msra.mxu1 %v1145_v6  ;;  %525 = vmatpush.bf16.msra.mxu2 %v1145_v6  ;;  %v1152_v33 = vld [vmem:[%s1515_s4] sm:$0xff]  ;;  %v1166_v54 = vld [vmem:[%s1516_s5 + $0x30] sm:$0xff]  ;;  %v1165_v55 = vld [vmem:[%s1516_s5 + $0x28] sm:$0xff] }
  0x20   : > { %558 = vmatpush.bf16.msra.mxu3 %v1145_v6  ;;  %v1164_v56 = vld [vmem:[%s1516_s5 + $0x20] sm:$0xff]  ;;  %v1163_v60 = vld [vmem:[%s1516_s5 + $0x18] sm:$0xff]  ;;  %v1162_v62 = vld [vmem:[%s1516_s5 + $0x10] sm:$0xff] }
  0x21   : > { %v1161_v63 = vld [vmem:[%s1516_s5 + $0x8] sm:$0xff] }
  0x22   : > { %377 = vmatpush.bf16.msra.mxu0 %v1136_v7  ;;  %v776_v17 = vld [vmem:[#allocation2 + $0x8] sm:$0xff] }
  0x23   : > { %493 = vmatpush.bf16.msra.mxu1 %v1144_v8  ;;  %526 = vmatpush.bf16.msra.mxu2 %v1144_v8 }
  0x24   : > { %559 = vmatpush.bf16.msra.mxu3 %v1144_v8 }
  0x26   : > { %378 = vmatpush.bf16.msra.mxu0 %v1135_v9 }
  0x27   : > { %494 = vmatpush.bf16.msra.mxu1 %v1143_v10  ;;  %527 = vmatpush.bf16.msra.mxu2 %v1143_v10 }
  0x28   : > { %560 = vmatpush.bf16.msra.mxu3 %v1143_v10 }
  0x2a   : > { %379 = vmatpush.bf16.msra.mxu0 %v1134_v11 }
  0x2b   : > { %495 = vmatpush.bf16.msra.mxu1 %v1142_v12  ;;  %528 = vmatpush.bf16.msra.mxu2 %v1142_v12 }
  0x2c   : > { %561 = vmatpush.bf16.msra.mxu3 %v1142_v12 }
  0x2e   : > { %380 = vmatpush.bf16.msra.mxu0 %v1133_v13 }
  0x2f   : > { %496 = vmatpush.bf16.msra.mxu1 %v1141_v14  ;;  %529 = vmatpush.bf16.msra.mxu2 %v1141_v14 }
  0x30   : > { %562 = vmatpush.bf16.msra.mxu3 %v1141_v14 }
  0x32   : > { %381 = vmatpush.bf16.msra.mxu0 %v1132_v15 }
  0x33   : > { %497 = vmatpush.bf16.msra.mxu1 %v1140_v16  ;;  %530 = vmatpush.bf16.msra.mxu2 %v1140_v16 }
  0x34   : > { %563 = vmatpush.bf16.msra.mxu3 %v1140_v16 }
  0x35   : > { %382 = vmatmul.bf16.vlgmr.msra.gmra.mxu0 %v1128_v19  ;;  %v1131_v19 = vld [vmem:[%s1372_s30 + $0x18] sm:$0xff] }
  0x36   : > { %498 = vmatmul.bf16.vlgmr.msra.gmra.mxu1 %v441_v20  ;;  %854 = vmatpush.bf16.msrb.mxu0 %v1167_v52 }
  0x37   : > { %589 = vmatpush.bf16.msrb.mxu1 %v1147_v2  ;;  %713 = vmatpush.bf16.msrb.mxu2 %v1159_v21  ;;  %v1160_v2 = vld [vmem:[%s1516_s5] sm:$0xff] }
  0x38   : > { %830 = vmatpush.bf16.msrb.mxu3 %v1167_v52 }
  0x3a   : > { %855 = vmatpush.bf16.msrb.mxu0 %v1166_v54 }
  0x3b   : > { %590 = vmatpush.bf16.msrb.mxu1 %v1146_v4  ;;  %714 = vmatpush.bf16.msrb.mxu2 %v1158_v22 }
  0x3c   : > { %831 = vmatpush.bf16.msrb.mxu3 %v1166_v54 }
  0x3e   : > { %856 = vmatpush.bf16.msrb.mxu0 %v1165_v55 }
  0x3f   : > { %591 = vmatpush.bf16.msrb.mxu1 %v1145_v6  ;;  %715 = vmatpush.bf16.msrb.mxu2 %v1157_v24 }
  0x40   : > { %832 = vmatpush.bf16.msrb.mxu3 %v1165_v55 }
  0x42   : > { %857 = vmatpush.bf16.msrb.mxu0 %v1164_v56 }
  0x43   : > { %592 = vmatpush.bf16.msrb.mxu1 %v1144_v8  ;;  %716 = vmatpush.bf16.msrb.mxu2 %v1156_v25 }
  0x44   : > { %833 = vmatpush.bf16.msrb.mxu3 %v1164_v56 }
  0x45   : > { %387 = vmatmul.bf16.gmra.mxu0 %v1129_v23 }
  0x46   : > { %858 = vmatpush.bf16.msrb.mxu0 %v1163_v60 }
  0x47   : > { %593 = vmatpush.bf16.msrb.mxu1 %v1143_v10  ;;  %717 = vmatpush.bf16.msrb.mxu2 %v1155_v26 }
  0x48   : > { %834 = vmatpush.bf16.msrb.mxu3 %v1163_v60 }
  0x4a   : > { %859 = vmatpush.bf16.msrb.mxu0 %v1162_v62 }
  0x4b   : > { %594 = vmatpush.bf16.msrb.mxu1 %v1142_v12  ;;  %718 = vmatpush.bf16.msrb.mxu2 %v1154_v28 }
  0x4c   : > { %835 = vmatpush.bf16.msrb.mxu3 %v1162_v62 }
  0x4e   : > { %860 = vmatpush.bf16.msrb.mxu0 %v1161_v63 }
  0x4f   : > { %595 = vmatpush.bf16.msrb.mxu1 %v1141_v14  ;;  %719 = vmatpush.bf16.msrb.mxu2 %v1153_v30 }
  0x50   : > { %836 = vmatpush.bf16.msrb.mxu3 %v1161_v63 }
  0x52   : > { %861 = vmatpush.bf16.msrb.mxu0 %v1160_v2 }
  0x53   : > { %596 = vmatpush.bf16.msrb.mxu1 %v1140_v16  ;;  %720 = vmatpush.bf16.msrb.mxu2 %v1152_v33  ;;  %v775_v16 = vld [vmem:[#allocation2 + $0x18] sm:$0xff] }
  0x54   : > { %837 = vmatpush.bf16.msrb.mxu3 %v1160_v2  ;;  %v781_v18 = vpack.c.bf16 %v776_v17, %v775_v16 }
  0x55   : > { %392 = vmatmul.bf16.gmra.mxu0 %v1130_v51 }
  0x57   : > { %878 = vmatpush.bf16.msra.mxu1 %v1167_v52 }
  0x5b   : > { %879 = vmatpush.bf16.msra.mxu1 %v1166_v54 }
  0x5f   : > { %880 = vmatpush.bf16.msra.mxu1 %v1165_v55 }
  0x63   : > { %881 = vmatpush.bf16.msra.mxu1 %v1164_v56 }
  0x65   : > { %397 = vmatmul.bf16.gmra.mxu0 %v1131_v19 }
  0x67   : > { %882 = vmatpush.bf16.msra.mxu1 %v1163_v60 }
  0x6b   : > { %883 = vmatpush.bf16.msra.mxu1 %v1162_v62 }
  0x6f   : > { %884 = vmatpush.bf16.msra.mxu1 %v1161_v63 }
  0x73   : > { %885 = vmatpush.bf16.msra.mxu1 %v1160_v2 }
  0xb2   : > { %v383_v27 = vpop.f32.mrf.mxu0 }
  0xb3   : > { %v499_v29 = vpop.f32.mrf.mxu1  ;;  %v384_v34 = vadd.f32 %v1449_v31, %v383_v27 }
  0xba   : > { %v385_v32 = vpop.f32.mrf.mxu0 }
  0xbb   : > { %v386_v35 = vadd.f32 %v1449_v31, %v385_v32  ;;  %v501_v39 = vpop.f32.mrf.mxu1 }
  0xbd   : > { %v1171_v36 = vpack.c.bf16 %v386_v35, %v384_v34  ;;  %v1489_v34 = vld [vmem:[%s1517_s6] ss:$0 sm:$0xff] }
  0xbf   : > { %v1190_v37 = vunpack.c.l.bf16 %v1171_v36  ;;  %v1191_v38 = vunpack.c.h.bf16 %v1171_v36 }
  0xc1   : > { %v504_v40 = vadd.f32 %v1190_v37, %v499_v29  ;;  %v505_v41 = vadd.f32 %v1191_v38, %v501_v39 }
  0xc2   : > { %v388_v53 = vpop.f32.mrf.mxu0 }
  0xc3   : > { %1277 = vtanh.f32 %v504_v40  ;;  %v389_v58 = vadd.f32 %v1449_v31, %v388_v53 }
  0xc4   : > { %1279 = vtanh.f32 %v505_v41 }
  0xc9   : > { %v1278_v42 = vpop.eup %1277 }
  0xca   : > { %v1280_v43 = vpop.eup %1279  ;;  %v508_v44 = vpack.c.bf16 %v1278_v42, %v1278_v42  ;;  %v390_v57 = vpop.f32.mrf.mxu0 }
  0xcb   : > { %v1195_v45 = vpack.c.bf16 %v1280_v43, %v1278_v42  ;;  %v509_v46 = vpack.c.bf16 %v1280_v43, %v1280_v43  ;;  %v391_v59 = vadd.f32 %v1449_v31, %v390_v57 }
  0xcc   : > { %v519_v47 = vunpack.c.l.b16 %v508_v44 }
  0xcd   : > { %1196 = vst [vmem:[#allocation3] sm:$0xff] %v1195_v45   ;;  %v520_v48 = vunpack.c.l.b16 %v509_v46  ;;  %v1176_v61 = vpack.c.bf16 %v391_v59, %v389_v58 }
  0xcf   : > { %v521_v49 = vpack.c.b16 %v520_v48, %v519_v47  ;;  %v1199_v0 = vunpack.c.l.bf16 %v1176_v61  ;;  %v1200_v4 = vunpack.c.h.bf16 %v1176_v61 }
  0xd1   : > { %531 = vmatmul.bf16.vlgmr.msra.gmra.mxu2 %v521_v49 }
  0xd2   : > { %v393_v20 = vpop.f32.mrf.mxu0 }
  0xd3   : > { %v394_v22 = vadd.f32 %v1449_v31, %v393_v20 }
  0xd4   : > { %v1148_v50 = vld [vmem:[#allocation3] sm:$0xff] }
  0xda   : > { %v395_v21 = vpop.f32.mrf.mxu0 }
  0xdb   : > { %v396_v23 = vadd.f32 %v1449_v31, %v395_v21 }
  0xdd   : > { %v1181_v24 = vpack.c.bf16 %v396_v23, %v394_v22 }
  0xdf   : > { %v1208_v26 = vunpack.c.l.bf16 %v1181_v24  ;;  %v1209_v29 = vunpack.c.h.bf16 %v1181_v24 }
  0xe1   : > { %721 = vmatmul.bf16.vlgmr.msrb.gmra.mxu2 %v1148_v50 }
 0x154   : > { %v532_v1 = vpop.f32.mrf.mxu2 }
 0x155   : > { %v537_v3 = vadd.f32 %v1199_v0, %v532_v1 }
 0x157   : > { %1281 = vtanh.f32 %v537_v3 }
 0x15c   : > { %v534_v5 = vpop.f32.mrf.mxu2 }
 0x15d   : > { %v538_v6 = vadd.f32 %v1200_v4, %v534_v5  ;;  %v1282_v7 = vpop.eup %1281 }
 0x15e   : > { %v541_v8 = vpack.c.bf16 %v1282_v7, %v1282_v7 }
 0x15f   : > { %1283 = vtanh.f32 %v538_v6 }
 0x160   : > { %v552_v12 = vunpack.c.l.b16 %v541_v8 }
 0x164   : > { %v722_v25 = vpop.f32.mrf.mxu2 }
 0x165   : > { %v1284_v9 = vpop.eup %1283  ;;  %v723_v37 = vadd.f32 %v1489_v34, %v722_v25 }
 0x166   : > { %v1204_v10 = vpack.c.bf16 %v1284_v9, %v1282_v7  ;;  %v542_v11 = vpack.c.bf16 %v1284_v9, %v1284_v9 }
 0x168   : > { %1205 = vst [vmem:[#allocation3 + $0x18] sm:$0xff] %v1204_v10   ;;  %v553_v13 = vunpack.c.l.b16 %v542_v11 }
 0x16a   : > { %v554_v14 = vpack.c.b16 %v553_v13, %v552_v12 }
 0x16c   : > { %564 = vmatmul.bf16.vlgmr.msra.gmra.mxu3 %v554_v14  ;;  %v724_v32 = vpop.f32.mrf.mxu2 }
 0x16d   : > { %902 = vmatpush.bf16.msra.mxu3 %v1167_v52  ;;  %v725_v35 = vadd.f32 %v1489_v34, %v724_v32 }
 0x16f   : > { %v1149_v15 = vld [vmem:[#allocation3 + $0x18] sm:$0xff]  ;;  %v1227_v38 = vpack.c.bf16 %v725_v35, %v723_v37 }
 0x170   : > { %726 = vmatmul.bf16.gmra.mxu2 %v1149_v15 }
 0x171   : > { %903 = vmatpush.bf16.msra.mxu3 %v1166_v54  ;;  %v1246_v44 = vunpack.c.l.bf16 %v1227_v38  ;;  %v1247_v49 = vunpack.c.h.bf16 %v1227_v38 }
 0x175   : > { %904 = vmatpush.bf16.msra.mxu3 %v1165_v55 }
 0x179   : > { %905 = vmatpush.bf16.msra.mxu3 %v1164_v56  ;;  %v398_v56 = vpop.f32.mrf.mxu0 }
 0x17a   : > { %v399_v58 = vadd.f32 %v1449_v31, %v398_v56 }
 0x17c   : > { %838 = vmatmul.bf16.vlgmr.msrb.gmra.mxu3 %v781_v18 }
 0x17d   : > { %906 = vmatpush.bf16.msra.mxu3 %v1163_v60 }
 0x181   : > { %907 = vmatpush.bf16.msra.mxu3 %v1162_v62  ;;  %v400_v57 = vpop.f32.mrf.mxu0 }
 0x182   : > { %v401_v59 = vadd.f32 %v1449_v31, %v400_v57 }
 0x184   : > { %v1186_v60 = vpack.c.bf16 %v401_v59, %v399_v58 }
 0x185   : > { %908 = vmatpush.bf16.msra.mxu3 %v1161_v63 }
 0x186   : > { %v1217_v62 = vunpack.c.l.bf16 %v1186_v60 }
 0x189   : > { %909 = vmatpush.bf16.msra.mxu3 %v1160_v2  ;;  %v1218_v2 = vunpack.c.h.bf16 %v1186_v60 }
 0x1ef   : > { %v565_v27 = vpop.f32.mrf.mxu3 }
 0x1f0   : > { %v570_v28 = vadd.f32 %v1208_v26, %v565_v27 }
 0x1f2   : > { %1285 = vtanh.f32 %v570_v28 }
 0x1f3   : > { %v727_v61 = vpop.f32.mrf.mxu2 }
 0x1f4   : > { %v728_v7 = vadd.f32 %v1489_v34, %v727_v61 }
 0x1f7   : > { %v567_v30 = vpop.f32.mrf.mxu3 }
 0x1f8   : > { %v571_v33 = vadd.f32 %v1209_v29, %v567_v30  ;;  %v1286_v36 = vpop.eup %1285 }
 0x1f9   : > { %v574_v40 = vpack.c.bf16 %v1286_v36, %v1286_v36 }
 0x1fa   : > { %1287 = vtanh.f32 %v571_v33 }
 0x1fb   : > { %v585_v45 = vunpack.c.l.b16 %v574_v40  ;;  %v729_v1 = vpop.f32.mrf.mxu2 }
 0x1fc   : > { %v730_v3 = vadd.f32 %v1489_v34, %v729_v1 }
 0x1fe   : > { %v1232_v8 = vpack.c.bf16 %v730_v3, %v728_v7 }
 0x1ff   : > { %v839_v39 = vpop.f32.mrf.mxu3 }
 0x200   : > { %v1288_v41 = vpop.eup %1287  ;;  %v844_v47 = vadd.f32 %v1246_v44, %v839_v39  ;;  %v1250_v31 = vunpack.c.l.bf16 %v1232_v8  ;;  %v1251_v13 = vunpack.c.h.bf16 %v1232_v8 }
 0x201   : > { %v1213_v42 = vpack.c.bf16 %v1288_v41, %v1286_v36  ;;  %v575_v43 = vpack.c.bf16 %v1288_v41, %v1288_v41 }
 0x202   : > { %1289 = vtanh.f32 %v844_v47 }
 0x203   : > { %1214 = vst [vmem:[#allocation3 + $0x8] sm:$0xff] %v1213_v42   ;;  %v586_v46 = vunpack.c.l.b16 %v575_v43 }
 0x205   : > { %v587_v48 = vpack.c.b16 %v586_v46, %v585_v45 }
 0x207   : > { %597 = vmatmul.bf16.vlgmr.msrb.gmra.mxu1 %v587_v48  ;;  %v841_v50 = vpop.f32.mrf.mxu3 }
 0x208   : > { %v845_v51 = vadd.f32 %v1247_v49, %v841_v50  ;;  %v1290_v53 = vpop.eup %1289 }
 0x20a   : > { %1291 = vtanh.f32 %v845_v51  ;;  %v1150_v52 = vld [vmem:[#allocation3 + $0x8] sm:$0xff] }
 0x20b   : > { %731 = vmatmul.bf16.gmra.mxu2 %v1150_v52 }
 0x210   : > { %v1292_v54 = vpop.eup %1291 }
 0x211   : > { %v853_v55 = vpack.c.bf16 %v1292_v54, %v1290_v53 }
 0x213   : > { %862 = vmatmul.bf16.vlgmr.msrb.gmra.mxu0 %v853_v55 }
 0x284   : > { %v598_v63 = vpop.f32.mrf.mxu1 }
 0x285   : > { %v603_v0 = vadd.f32 %v1217_v62, %v598_v63 }
 0x287   : > { %1293 = vtanh.f32 %v603_v0 }
 0x28c   : > { %v600_v4 = vpop.f32.mrf.mxu1 }
 0x28d   : > { %v1294_v5 = vpop.eup %1293  ;;  %v604_v6 = vadd.f32 %v1218_v2, %v600_v4 }
 0x28e   : > { %611 = vst [vmem:[#allocation2 + $0x10] sm:$0xff] %v1294_v5  ;;  %v732_v20 = vpop.f32.mrf.mxu2 }
 0x28f   : > { %1295 = vtanh.f32 %v604_v6  ;;  %v733_v23 = vadd.f32 %v1489_v34, %v732_v20 }
 0x290   : > { %v863_v9 = vpop.f32.mrf.mxu0 }
 0x291   : > { %v868_v12 = vadd.f32 %v1250_v31, %v863_v9 }
 0x293   : > { %1297 = vtanh.f32 %v868_v12 }
 0x295   : > { %v1296_v10 = vpop.eup %1295 }
 0x296   : > { %v1222_v11 = vpack.c.bf16 %v1296_v10, %v1294_v5  ;;  %612 = vst [vmem:[#allocation2] sm:$0xff] %v1296_v10  ;;  %v734_v21 = vpop.f32.mrf.mxu2 }
 0x297   : > { %v735_v22 = vadd.f32 %v1489_v34, %v734_v21 }
 0x298   : > { %1223 = vst [vmem:[#allocation3 + $0x10] sm:$0xff] %v1222_v11   ;;  %v865_v14 = vpop.f32.mrf.mxu0 }
 0x299   : > { %v869_v15 = vadd.f32 %v1251_v13, %v865_v14  ;;  %v1298_v17 = vpop.eup %1297  ;;  %v1237_v24 = vpack.c.bf16 %v735_v22, %v733_v23 }
 0x29b   : > { %1299 = vtanh.f32 %v869_v15  ;;  %v1254_v26 = vunpack.c.l.bf16 %v1237_v24  ;;  %v1255_v28 = vunpack.c.h.bf16 %v1237_v24 }
 0x29f   : > { %v1151_v16 = vld [vmem:[#allocation3 + $0x10] sm:$0xff] }
 0x2a0   : > { %736 = vmatmul.bf16.gmra.mxu2 %v1151_v16 }
 0x2a1   : > { %v1300_v18 = vpop.eup %1299 }
 0x2a2   : > { %v877_v19 = vpack.c.bf16 %v1300_v18, %v1298_v17 }
 0x2a4   : > { %886 = vmatmul.bf16.vlgmr.msra.gmra.mxu1 %v877_v19 }
 0x321   : > { %v887_v25 = vpop.f32.mrf.mxu1 }
 0x322   : > { %v892_v27 = vadd.f32 %v1254_v26, %v887_v25 }
 0x323   : > { %v737_v36 = vpop.f32.mrf.mxu2 }
 0x324   : > { %1301 = vtanh.f32 %v892_v27  ;;  %v738_v39 = vadd.f32 %v1489_v34, %v737_v36 }
 0x329   : > { %v889_v29 = vpop.f32.mrf.mxu1 }
 0x32a   : > { %v893_v30 = vadd.f32 %v1255_v28, %v889_v29  ;;  %v1302_v32 = vpop.eup %1301 }
 0x32b   : > { %v739_v37 = vpop.f32.mrf.mxu2 }
 0x32c   : > { %1303 = vtanh.f32 %v893_v30  ;;  %v740_v38 = vadd.f32 %v1489_v34, %v739_v37 }
 0x32e   : > { %v1242_v40 = vpack.c.bf16 %v740_v38, %v738_v39 }
 0x330   : > { %v1258_v41 = vunpack.c.l.bf16 %v1242_v40  ;;  %v1259_v44 = vunpack.c.h.bf16 %v1242_v40 }
 0x332   : > { %v1304_v33 = vpop.eup %1303 }
 0x333   : > { %v901_v35 = vpack.c.bf16 %v1304_v33, %v1302_v32 }
 0x335   : > { %910 = vmatmul.bf16.vlgmr.msra.gmra.mxu3 %v901_v35 }
 0x3b8   : > { %v911_v42 = vpop.f32.mrf.mxu3 }
 0x3b9   : > { %v916_v43 = vadd.f32 %v1258_v41, %v911_v42 }
 0x3bb   : > { %1305 = vtanh.f32 %v916_v43 }
 0x3c0   : > { %v913_v45 = vpop.f32.mrf.mxu3 }
 0x3c1   : > { %v1306_v46 = vpop.eup %1305  ;;  %v917_v47 = vadd.f32 %v1259_v44, %v913_v45 }
 0x3c2   : > { %920 = vst [vmem:[#allocation2 + $0x18] sm:$0xff] %v1306_v46 }
 0x3c3   : > { %1307 = vtanh.f32 %v917_v47 }
 0x3c6   : > { %925 = sbr.rel (%p1125_p5) target bundleno = 979 (0x3d3), region = 56 }
 0x3c9   : > { %v1308_v48 = vpop.eup %1307 }
 0x3ca   : > { %921 = vst [vmem:[#allocation2 + $0x8] sm:$0xff] %v1308_v48 }
 0x3cb   : > { %v926_v49 = vld [vmem:[#allocation2 + $0x18] sm:$0xff] }
 0x3cc   : > { %928 = vst [vmem:[%s1518_s7] sm:$0xff] %v926_v49 }
 0x3d1   : > { %v927_v50 = vld [vmem:[#allocation2 + $0x8] sm:$0xff] }
 0x3d2   : > { %929 = vst [vmem:[%s1518_s7 + $0x8] sm:$0xff] %v927_v50 }
 0x3d3 PF: > { %s17_s24 = sadd.s32 1, %s1315_s24  }
 0x3d4   : > { %p14_p6 = scmp.ge.s32.totalorder %s17_s24, 4  }
 0x3d6   :  { %16 = sbr.rel (!%p14_p6) target bundleno = 1 (0x1), region = 89 }

</bundles_post_ra>
